<compile_context>
chip_gen: v6e
topology: v6e:2x2x1
jax: 0.10.0
libtpu: 0.0.40
codegen_flags: <defaults>
</compile_context>

<pallas_src>
import functools

import jax
import jax.numpy as jnp
from jax.experimental import pallas as pl
from jax.experimental.pallas import tpu as pltpu


def _round_up(x, m):
    return (x + m - 1) // m * m


# -----------------------------------------------------------------------------
# Fused ResBlock kernel — one grid step == one batch element (channels-last)
# -----------------------------------------------------------------------------
def resblock_kernel(*refs, k, L, data_off, Lpad, sub, identity_shortcut, cdtype):
    # refs (identity shortcut):      x, w1, b1, w2, b2, o, xp, hp
    # refs (projection shortcut):    x, w1, b1, w2, b2, ws, bs, o, xp, hp
    if identity_shortcut:
        (x_ref, w1_ref, b1_ref, w2_ref, b2_ref, o_ref, xp_ref, hp_ref) = refs
        ws_ref = bs_ref = None
    else:
        (x_ref, w1_ref, b1_ref, w2_ref, b2_ref, ws_ref, bs_ref,
         o_ref, xp_ref, hp_ref) = refs

    p = (k - 1) // 2
    Cin = xp_ref.shape[1]
    C = hp_ref.shape[1]
    tail0 = (data_off + L) // sub * sub          # aligned start of the right-pad zeros

    x = x_ref[0]                                 # (L, Cin), compute dtype

    # ---- pack x into a zero-padded scratch slab (only the gaps are zeroed) ----
    xp_ref[0:data_off, :] = jnp.zeros((data_off, Cin), cdtype)
    if tail0 < Lpad:
        xp_ref[tail0:Lpad, :] = jnp.zeros((Lpad - tail0, Cin), cdtype)
    xp_ref[data_off:data_off + L, :] = x         # aligned row offset

    # ---- conv1 (+ folded BN1): taps folded into the contraction dim ----
    xpad = xp_ref[...]
    lhs1 = jnp.concatenate(
        [xpad[data_off - p + t:data_off - p + t + L, :] for t in range(k)], axis=-1)
    h1 = jnp.dot(lhs1, w1_ref[...], preferred_element_type=jnp.float32)
    h1 = jnp.maximum(h1 + b1_ref[...], 0.0)      # bias + relu (dropout == identity)

    # ---- repack as the zero-padded conv2 input ----
    hp_ref[0:data_off, :] = jnp.zeros((data_off, C), cdtype)
    if tail0 < Lpad:
        hp_ref[tail0:Lpad, :] = jnp.zeros((Lpad - tail0, C), cdtype)
    hp_ref[data_off:data_off + L, :] = h1.astype(cdtype)

    # ---- conv2 (+ folded BN2) ----
    hpad = hp_ref[...]
    lhs2 = jnp.concatenate(
        [hpad[data_off - p + t:data_off - p + t + L, :] for t in range(k)], axis=-1)
    h2 = jnp.dot(lhs2, w2_ref[...], preferred_element_type=jnp.float32) + b2_ref[...]

    # ---- shortcut: identity (no matmul) or 1x1 conv + BN over the L valid rows ----
    if identity_shortcut:
        residual = x.astype(jnp.float32)
    else:
        residual = (jnp.dot(x, ws_ref[...], preferred_element_type=jnp.float32)
                    + bs_ref[...])

    o_ref[0] = jnp.maximum(h2 + residual, 0.0).astype(o_ref.dtype)


def resblock_forward(params, x_bcl, *, kernel_size, compute_dtype=jnp.bfloat16):
    """x_bcl: (B, Cin, L) as in the PyTorch module; returns (B, Cout, L) float32."""
    assert kernel_size % 2 == 1, "ResBlock 'same' padding requires odd kernel_size"
    B, Cin, L = x_bcl.shape
    C = params['w2'].shape[1]
    k = kernel_size
    p = k // 2

    sub = 8 if jnp.dtype(compute_dtype).itemsize == 4 else 16   # sublane packing
    data_off = sub                                              # aligned data start
    assert data_off >= p, "kernel_size too large for the fixed scratch offset"
    Lpad = _round_up(data_off + L + p, sub)

    identity_shortcut = 'ws' not in params

    x_blc = jnp.transpose(x_bcl, (0, 2, 1)).astype(compute_dtype)  # channels-last

    def full_spec(a):
        return pl.BlockSpec(a.shape, lambda b, _n=a.ndim: (0,) * _n)

    inputs = [x_blc, params['w1'], params['b1'], params['w2'], params['b2']]
    in_specs = [pl.BlockSpec((1, L, Cin), lambda b: (b, 0, 0))]
    in_specs += [full_spec(a) for a in inputs[1:]]
    if not identity_shortcut:
        inputs += [params['ws'], params['bs']]
        in_specs += [full_spec(params['ws']), full_spec(params['bs'])]

    kern = functools.partial(
        resblock_kernel, k=k, L=L, data_off=data_off, Lpad=Lpad, sub=sub,
        identity_shortcut=identity_shortcut, cdtype=compute_dtype)

    flops = 2 * B * L * (k * Cin * C + k * C * C)
    if not identity_shortcut:
        flops += 2 * B * L * Cin * C
    bytes_accessed = (x_blc.size * x_blc.dtype.itemsize
                      + sum(a.size * a.dtype.itemsize for a in inputs[1:])
                      + B * L * C * 4)

    out_blc = pl.pallas_call(
        kern,
        out_shape=jax.ShapeDtypeStruct((B, L, C), jnp.float32),
        grid_spec=pltpu.PrefetchScalarGridSpec(
            num_scalar_prefetch=0,
            grid=(B,),
            in_specs=in_specs,
            out_specs=pl.BlockSpec((1, L, C), lambda b: (b, 0, 0)),
            scratch_shapes=[pltpu.VMEM((Lpad, Cin), compute_dtype),
                            pltpu.VMEM((Lpad, C), compute_dtype)]),
        compiler_params=pltpu.CompilerParams(
            dimension_semantics=("parallel",),
            vmem_limit_bytes=32 * 1024 * 1024),
        cost_estimate=pl.CostEstimate(flops=flops, transcendentals=0,
                                      bytes_accessed=bytes_accessed),
    )(*inputs)
    return jnp.transpose(out_blc, (0, 2, 1))


# -----------------------------------------------------------------------------
# Parameter construction: raw PyTorch-layout params -> BN-folded kernel params
# -----------------------------------------------------------------------------
def _rand_bn(key, c):
    k1, k2, k3, k4 = jax.random.split(key, 4)
    gamma = 1.0 + 0.1 * jax.random.normal(k1, (c,), jnp.float32)
    beta = 0.1 * jax.random.normal(k2, (c,), jnp.float32)
    mean = 0.1 * jax.random.normal(k3, (c,), jnp.float32)
    var = 1.0 + 0.1 * jnp.abs(jax.random.normal(k4, (c,), jnp.float32))
    return gamma, beta, mean, var


def init_raw_params(key, cin, cout, k):
    ks = jax.random.split(key, 9)
    raw = {}
    s1 = 1.0 / jnp.sqrt(cin * k)
    raw['w1'] = s1 * jax.random.normal(ks[0], (cout, cin, k), jnp.float32)   # (O,I,K)
    raw['b1'] = s1 * jax.random.normal(ks[1], (cout,), jnp.float32)
    raw['bn1'] = _rand_bn(ks[2], cout)
    s2 = 1.0 / jnp.sqrt(cout * k)
    raw['w2'] = s2 * jax.random.normal(ks[3], (cout, cout, k), jnp.float32)
    raw['b2'] = s2 * jax.random.normal(ks[4], (cout,), jnp.float32)
    raw['bn2'] = _rand_bn(ks[5], cout)
    if cin != cout:
        ss = 1.0 / jnp.sqrt(cin)
        raw['ws'] = ss * jax.random.normal(ks[6], (cout, cin, 1), jnp.float32)
        raw['ws_b'] = ss * jax.random.normal(ks[7], (cout,), jnp.float32)
        raw['bns'] = _rand_bn(ks[8], cout)
    return raw


def fold_params(raw, cin, cout, *, compute_dtype=jnp.bfloat16, eps=1e-5):
    """Fold BN into conv weights/bias; reshape weights to (k*Cin, Cout) for the
    tap-folded (im2col) matmul. Weights in compute dtype, biases stay f32."""
    def fold_conv(w_oik, bias, bn):
        gamma, beta, mean, var = bn
        scale = gamma / jnp.sqrt(var + eps)
        w_kio = jnp.transpose(w_oik, (2, 1, 0)) * scale[None, None, :]   # (k, I, O)
        kk, ii, oo = w_kio.shape
        w2d = w_kio.reshape(kk * ii, oo).astype(compute_dtype)
        b = (bias * scale + beta - mean * scale).reshape(1, -1).astype(jnp.float32)
        return w2d, b

    p = {}
    p['w1'], p['b1'] = fold_conv(raw['w1'], raw['b1'], raw['bn1'])
    p['w2'], p['b2'] = fold_conv(raw['w2'], raw['b2'], raw['bn2'])
    if cin != cout:
        p['ws'], p['bs'] = fold_conv(raw['ws'], raw['ws_b'], raw['bns'])   # (Cin, Cout)
    return p


# -----------------------------------------------------------------------------
# Pure-JAX reference (eval-mode PyTorch semantics), for correctness checking
# -----------------------------------------------------------------------------
def _conv1d_ref(x_bcl, w_oik, bias, padding):
    y = jax.lax.conv_general_dilated(
        x_bcl, w_oik, window_strides=(1,), padding=[(padding, padding)],
        dimension_numbers=('NCH', 'OIH', 'NCH'))
    return y + bias[None, :, None]


def _bn_ref(x_bcl, bn, eps=1e-5):
    gamma, beta, mean, var = bn
    return ((x_bcl - mean[None, :, None]) / jnp.sqrt(var[None, :, None] + eps)
            * gamma[None, :, None] + beta[None, :, None])


def resblock_ref(raw, x, k):
    if 'ws' in raw:
        residual = _bn_ref(_conv1d_ref(x, raw['ws'], raw['ws_b'], 0), raw['bns'])
    else:
        residual = x
    h = jax.nn.relu(_bn_ref(_conv1d_ref(x, raw['w1'], raw['b1'], k // 2), raw['bn1']))
    h = _bn_ref(_conv1d_ref(h, raw['w2'], raw['b2'], k // 2), raw['bn2'])
    return jax.nn.relu(h + residual)


if __name__ == "__main__":
    key = jax.random.PRNGKey(0)
    B, L, K = 2, 16, 3

    # (Cin != Cout) exercises the projection shortcut; (Cin == Cout) the identity path.
    for cin, cout in [(4, 16), (16, 16)]:
        key, kp, kx = jax.random.split(key, 3)
        raw = init_raw_params(kp, cin, cout, K)
        x = jax.random.normal(kx, (B, cin, L), jnp.float32)
        ref = resblock_ref(raw, x, K)

        for cdtype, atol, rtol in [(jnp.float32, 1e-3, 1e-3),
                                   (jnp.bfloat16, 1e-1, 5e-2)]:
            params = fold_params(raw, cin, cout, compute_dtype=cdtype)
            fwd = jax.jit(functools.partial(resblock_forward, kernel_size=K,
                                            compute_dtype=cdtype))
            out = jax.block_until_ready(fwd(params, x))
            assert out.shape == (B, cout, L), out.shape
            assert jnp.all(jnp.isfinite(out))
            err = float(jnp.max(jnp.abs(out - ref)))
            assert jnp.allclose(out, ref, atol=atol, rtol=rtol), (cin, cout, str(cdtype), err)

    print("KERNEL_OK")
</pallas_src>

<mosaic_0001>
module attributes {stable_mosaic.version = 11 : i64} {
  func.func @resblock_kernel(%arg0: i32, %arg1: memref<1x16x4xf32, #tpu.memory_space<vmem>>, %arg2: memref<12x16xf32, #tpu.memory_space<vmem>>, %arg3: memref<1x16xf32, #tpu.memory_space<vmem>>, %arg4: memref<48x16xf32, #tpu.memory_space<vmem>>, %arg5: memref<1x16xf32, #tpu.memory_space<vmem>>, %arg6: memref<4x16xf32, #tpu.memory_space<vmem>>, %arg7: memref<1x16xf32, #tpu.memory_space<vmem>>, %arg8: memref<1x16x16xf32, #tpu.memory_space<vmem>>, %arg9: memref<32x4xf32, #tpu.memory_space<vmem>>, %arg10: memref<32x16xf32, #tpu.memory_space<vmem>>) attributes {dimension_semantics = [#tpu.dimension_semantics<parallel>], iteration_bounds = array<i64: 2>, scalar_prefetch = 0 : i64, scratch_operands = 2 : i64, tpu.core_type = #tpu.core_type<tc>, window_params = [{transform_indices = @transform_0, window_bounds = array<i64: 1, 16, 4>}, {pipeline_mode = #tpu.pipeline_mode<synchronous>, transform_indices = @transform_1, window_bounds = array<i64: 12, 16>}, {pipeline_mode = #tpu.pipeline_mode<synchronous>, transform_indices = @transform_2, window_bounds = array<i64: 1, 16>}, {pipeline_mode = #tpu.pipeline_mode<synchronous>, transform_indices = @transform_3, window_bounds = array<i64: 48, 16>}, {pipeline_mode = #tpu.pipeline_mode<synchronous>, transform_indices = @transform_4, window_bounds = array<i64: 1, 16>}, {pipeline_mode = #tpu.pipeline_mode<synchronous>, transform_indices = @transform_5, window_bounds = array<i64: 4, 16>}, {pipeline_mode = #tpu.pipeline_mode<synchronous>, transform_indices = @transform_6, window_bounds = array<i64: 1, 16>}, {transform_indices = @transform_7, window_bounds = array<i64: 1, 16, 16>}]} {
    %c0 = arith.constant 0 : index
    %c0_0 = arith.constant 0 : index
    %c0_1 = arith.constant 0 : index
    %0 = vector.load %arg1[%c0, %c0_0, %c0_1] : memref<1x16x4xf32, #tpu.memory_space<vmem>>, vector<1x16x4xf32>
    %1 = vector.shape_cast %0 : vector<1x16x4xf32> to vector<16x4xf32>
    %cst = arith.constant 0.000000e+00 : f32
    %2 = vector.broadcast %cst : f32 to vector<8x4xf32>
    %c0_2 = arith.constant 0 : index
    %c0_3 = arith.constant 0 : index
    %3 = vector.load %arg9[%c0_2, %c0_3] : memref<32x4xf32, #tpu.memory_space<vmem>>, vector<8x4xf32>
    tpu.vector_store %arg9[%c0_2, %c0_3], %2 {strides = array<i32>} : memref<32x4xf32, #tpu.memory_space<vmem>>, vector<8x4xf32>,
    %cst_4 = arith.constant 0.000000e+00 : f32
    %4 = vector.broadcast %cst_4 : f32 to vector<8x4xf32>
    %c24 = arith.constant 24 : index
    %c0_5 = arith.constant 0 : index
    %5 = vector.load %arg9[%c24, %c0_5] : memref<32x4xf32, #tpu.memory_space<vmem>>, vector<8x4xf32>
    tpu.vector_store %arg9[%c24, %c0_5], %4 {strides = array<i32>} : memref<32x4xf32, #tpu.memory_space<vmem>>, vector<8x4xf32>,
    %c8 = arith.constant 8 : index
    %c0_6 = arith.constant 0 : index
    %6 = vector.load %arg9[%c8, %c0_6] : memref<32x4xf32, #tpu.memory_space<vmem>>, vector<16x4xf32>
    tpu.vector_store %arg9[%c8, %c0_6], %1 {strides = array<i32>} : memref<32x4xf32, #tpu.memory_space<vmem>>, vector<16x4xf32>,
    %c0_7 = arith.constant 0 : index
    %c0_8 = arith.constant 0 : index
    %7 = vector.load %arg9[%c0_7, %c0_8] : memref<32x4xf32, #tpu.memory_space<vmem>>, vector<32x4xf32>
    %8 = vector.extract_strided_slice %7 {offsets = [7, 0], sizes = [16, 4], strides = [1, 1]} : vector<32x4xf32> to vector<16x4xf32>
    %9 = vector.extract_strided_slice %7 {offsets = [8, 0], sizes = [16, 4], strides = [1, 1]} : vector<32x4xf32> to vector<16x4xf32>
    %10 = vector.extract_strided_slice %7 {offsets = [9, 0], sizes = [16, 4], strides = [1, 1]} : vector<32x4xf32> to vector<16x4xf32>
    %11 = tpu.concatenate %8, %9, %10 in 1 : vector<16x4xf32>, vector<16x4xf32>, vector<16x4xf32> -> vector<16x12xf32>
    %c0_9 = arith.constant 0 : index
    %c0_10 = arith.constant 0 : index
    %12 = vector.load %arg2[%c0_9, %c0_10] : memref<12x16xf32, #tpu.memory_space<vmem>>, vector<12x16xf32>
    %cst_11 = arith.constant dense<0.000000e+00> : vector<16x16xf32>
    %13 = tpu.matmul %11, %12, %cst_11 {dimension_numbers = #tpu.dot_dimension_numbers<[1], [0], [0], [1], [0, 0, 1, 1], [], []>} : vector<16x12xf32>, vector<12x16xf32>, vector<16x16xf32> -> vector<16x16xf32>
    %c0_12 = arith.constant 0 : index
    %c0_13 = arith.constant 0 : index
    %14 = vector.load %arg3[%c0_12, %c0_13] : memref<1x16xf32, #tpu.memory_space<vmem>>, vector<1x16xf32>
    %15 = vector.broadcast %14 : vector<1x16xf32> to vector<16x16xf32>
    %16 = arith.addf %13, %15 : vector<16x16xf32>
    %cst_14 = arith.constant 0.000000e+00 : f32
    %17 = vector.broadcast %cst_14 : f32 to vector<16x16xf32>
    %18 = arith.maximumf %16, %17 : vector<16x16xf32>
    %cst_15 = arith.constant 0.000000e+00 : f32
    %19 = vector.broadcast %cst_15 : f32 to vector<8x16xf32>
    %c0_16 = arith.constant 0 : index
    %c0_17 = arith.constant 0 : index
    %20 = vector.load %arg10[%c0_16, %c0_17] : memref<32x16xf32, #tpu.memory_space<vmem>>, vector<8x16xf32>
    tpu.vector_store %arg10[%c0_16, %c0_17], %19 {strides = array<i32>} : memref<32x16xf32, #tpu.memory_space<vmem>>, vector<8x16xf32>,
    %cst_18 = arith.constant 0.000000e+00 : f32
    %21 = vector.broadcast %cst_18 : f32 to vector<8x16xf32>
    %c24_19 = arith.constant 24 : index
    %c0_20 = arith.constant 0 : index
    %22 = vector.load %arg10[%c24_19, %c0_20] : memref<32x16xf32, #tpu.memory_space<vmem>>, vector<8x16xf32>
    tpu.vector_store %arg10[%c24_19, %c0_20], %21 {strides = array<i32>} : memref<32x16xf32, #tpu.memory_space<vmem>>, vector<8x16xf32>,
    %c8_21 = arith.constant 8 : index
    %c0_22 = arith.constant 0 : index
    %23 = vector.load %arg10[%c8_21, %c0_22] : memref<32x16xf32, #tpu.memory_space<vmem>>, vector<16x16xf32>
    tpu.vector_store %arg10[%c8_21, %c0_22], %18 {strides = array<i32>} : memref<32x16xf32, #tpu.memory_space<vmem>>, vector<16x16xf32>,
    %c0_23 = arith.constant 0 : index
    %c0_24 = arith.constant 0 : index
    %24 = vector.load %arg10[%c0_23, %c0_24] : memref<32x16xf32, #tpu.memory_space<vmem>>, vector<32x16xf32>
    %25 = vector.extract_strided_slice %24 {offsets = [7, 0], sizes = [16, 16], strides = [1, 1]} : vector<32x16xf32> to vector<16x16xf32>
    %26 = vector.extract_strided_slice %24 {offsets = [8, 0], sizes = [16, 16], strides = [1, 1]} : vector<32x16xf32> to vector<16x16xf32>
    %27 = vector.extract_strided_slice %24 {offsets = [9, 0], sizes = [16, 16], strides = [1, 1]} : vector<32x16xf32> to vector<16x16xf32>
    %28 = tpu.concatenate %25, %26, %27 in 1 : vector<16x16xf32>, vector<16x16xf32>, vector<16x16xf32> -> vector<16x48xf32>
    %c0_25 = arith.constant 0 : index
    %c0_26 = arith.constant 0 : index
    %29 = vector.load %arg4[%c0_25, %c0_26] : memref<48x16xf32, #tpu.memory_space<vmem>>, vector<48x16xf32>
    %cst_27 = arith.constant dense<0.000000e+00> : vector<16x16xf32>
    %30 = tpu.matmul %28, %29, %cst_27 {dimension_numbers = #tpu.dot_dimension_numbers<[1], [0], [0], [1], [0, 0, 1, 1], [], []>} : vector<16x48xf32>, vector<48x16xf32>, vector<16x16xf32> -> vector<16x16xf32>
    %c0_28 = arith.constant 0 : index
    %c0_29 = arith.constant 0 : index
    %31 = vector.load %arg5[%c0_28, %c0_29] : memref<1x16xf32, #tpu.memory_space<vmem>>, vector<1x16xf32>
    %32 = vector.broadcast %31 : vector<1x16xf32> to vector<16x16xf32>
    %33 = arith.addf %30, %32 : vector<16x16xf32>
    %c0_30 = arith.constant 0 : index
    %c0_31 = arith.constant 0 : index
    %34 = vector.load %arg6[%c0_30, %c0_31] : memref<4x16xf32, #tpu.memory_space<vmem>>, vector<4x16xf32>
    %cst_32 = arith.constant dense<0.000000e+00> : vector<16x16xf32>
    %35 = tpu.matmul %1, %34, %cst_32 {dimension_numbers = #tpu.dot_dimension_numbers<[1], [0], [0], [1], [0, 0, 1, 1], [], []>} : vector<16x4xf32>, vector<4x16xf32>, vector<16x16xf32> -> vector<16x16xf32>
    %c0_33 = arith.constant 0 : index
    %c0_34 = arith.constant 0 : index
    %36 = vector.load %arg7[%c0_33, %c0_34] : memref<1x16xf32, #tpu.memory_space<vmem>>, vector<1x16xf32>
    %37 = vector.broadcast %36 : vector<1x16xf32> to vector<16x16xf32>
    %38 = arith.addf %35, %37 : vector<16x16xf32>
    %39 = arith.addf %33, %38 : vector<16x16xf32>
    %cst_35 = arith.constant 0.000000e+00 : f32
    %40 = vector.broadcast %cst_35 : f32 to vector<16x16xf32>
    %41 = arith.maximumf %39, %40 : vector<16x16xf32>
    %c0_36 = arith.constant 0 : index
    %c0_37 = arith.constant 0 : index
    %c0_38 = arith.constant 0 : index
    %42 = vector.load %arg8[%c0_36, %c0_37, %c0_38] : memref<1x16x16xf32, #tpu.memory_space<vmem>>, vector<1x16x16xf32>
    %43 = vector.shape_cast %42 : vector<1x16x16xf32> to vector<16x16xf32>
    %44 = vector.shape_cast %41 : vector<16x16xf32> to vector<1x16x16xf32>
    tpu.vector_store %arg8[%c0_36, %c0_37, %c0_38], %44 {strides = array<i32>} : memref<1x16x16xf32, #tpu.memory_space<vmem>>, vector<1x16x16xf32>,
    return
  }
  func.func @transform_0(%arg0: i32) -> (i32, i32, i32) {
    %c0_i32 = arith.constant 0 : i32
    %c0_i32_0 = arith.constant 0 : i32
    %c0_i32_1 = arith.constant 0 : i32
    return %arg0, %c0_i32, %c0_i32_0 : i32, i32, i32
  }
  func.func @transform_1(%arg0: i32) -> (i32, i32) {
    %c0_i32 = arith.constant 0 : i32
    %c0_i32_0 = arith.constant 0 : i32
    %c0_i32_1 = arith.constant 0 : i32
    return %c0_i32, %c0_i32_0 : i32, i32
  }
  func.func @transform_2(%arg0: i32) -> (i32, i32) {
    %c0_i32 = arith.constant 0 : i32
    %c0_i32_0 = arith.constant 0 : i32
    %c0_i32_1 = arith.constant 0 : i32
    return %c0_i32, %c0_i32_0 : i32, i32
  }
  func.func @transform_3(%arg0: i32) -> (i32, i32) {
    %c0_i32 = arith.constant 0 : i32
    %c0_i32_0 = arith.constant 0 : i32
    %c0_i32_1 = arith.constant 0 : i32
    return %c0_i32, %c0_i32_0 : i32, i32
  }
  func.func @transform_4(%arg0: i32) -> (i32, i32) {
    %c0_i32 = arith.constant 0 : i32
    %c0_i32_0 = arith.constant 0 : i32
    %c0_i32_1 = arith.constant 0 : i32
    return %c0_i32, %c0_i32_0 : i32, i32
  }
  func.func @transform_5(%arg0: i32) -> (i32, i32) {
    %c0_i32 = arith.constant 0 : i32
    %c0_i32_0 = arith.constant 0 : i32
    %c0_i32_1 = arith.constant 0 : i32
    return %c0_i32, %c0_i32_0 : i32, i32
  }
  func.func @transform_6(%arg0: i32) -> (i32, i32) {
    %c0_i32 = arith.constant 0 : i32
    %c0_i32_0 = arith.constant 0 : i32
    %c0_i32_1 = arith.constant 0 : i32
    return %c0_i32, %c0_i32_0 : i32, i32
  }
  func.func @transform_7(%arg0: i32) -> (i32, i32, i32) {
    %c0_i32 = arith.constant 0 : i32
    %c0_i32_0 = arith.constant 0 : i32
    %c0_i32_1 = arith.constant 0 : i32
    return %arg0, %c0_i32, %c0_i32_0 : i32, i32, i32
  }
}

</mosaic_0001>

<bundles_post_ra>
// kernel: resblock_forward.1
= control target key start
LH: loop header
LB: loop body
LE: loop exit
PB: predicated region body
PF: predicated region fallthrough
CT: control target
= control target key end

     0   :  { %s863_s24 = smov 0   ;;  %s963_s0 = inlined_call_operand.vmem [shape: f32[2,16,4], index: 0, kind: input, shape index: {}]   ;;  %s964_s1 = inlined_call_operand.vmem [shape: f32[12,16], index: 1, kind: input, shape index: {}]   ;;  %s965_s2 = inlined_call_operand.vmem [shape: f32[1,16], index: 2, kind: input, shape index: {}]   ;;  %s966_s3 = inlined_call_operand.vmem [shape: f32[48,16], index: 3, kind: input, shape index: {}]   ;;  %s967_s4 = inlined_call_operand.vmem [shape: f32[1,16], index: 4, kind: input, shape index: {}]   ;;  %s968_s5 = inlined_call_operand.vmem [shape: f32[4,16], index: 5, kind: input, shape index: {}]   ;;  %s969_s6 = inlined_call_operand.vmem [shape: f32[1,16], index: 6, kind: input, shape index: {}]   ;;  %s970_s7 = inlined_call_operand.vmem [shape: f32[2,16,16], index: 7, kind: output, shape index: {}]  }
   0x1 LB: > { %s731_s25 = sadd.s32 4294967295, %s816_s24   ;;  %p735_p0 = scmp.ge.s32.totalorder %s816_s24, 1  ;;  %s816_s24 = sphi %s863_s24, %s17_s24  }
   0x2   : > { %p237_p1 = scmp.lt.s32.totalorder %s816_s24, 3 }
   0x4   : > { %p238_p2 = pnand %p735_p0, %p237_p1 }
   0x5   : > { %p269_p3 = scmp.lt.s32.totalorder (!%p238_p2), %s731_s25, 1  ;;  %s819_s11 = smov (!%p238_p2), 4  }
   0x6   : > { %241 = sbr.rel (%p238_p2) target bundleno = 691 (0x2b3), region = 48  ;;  %s820_s12 = smov (!%p238_p2), 8  }
   0x7   : > { %s821_s9 = smov (!%p238_p2), 16   ;;  %s822_s10 = smov (!%p238_p2), 32  }
   0xb   : > { %vm281_vm0 = vcmask 31744   ;;  %v818_v0 = vmov 0.0   ;;  %s972_s25 = smov (!%p269_p3, %s731_s25), 1  ;;  %v329_v3 = vld [vmem:[%s964_s1 + $0x8] sm:$0xf]  ;;  %vm351_vm1 = vcmask 1043456  }
   0xc   : > { %283 = vst.msk [vmem:[#allocation2 + $0x18] sm:$0xff] %vm281_vm0, %v818_v0  ;;  %282 = vst.msk [vmem:[#allocation2] sm:$0xff] %vm281_vm0, %v818_v0  ;;  %s753_s26 = sshll.u32 %s972_s25, 4  ;;  %770 = vmatprep.subr.msk.mxu0 %vm351_vm1, %v329_v3  ;;  %v328_v4 = vld [vmem:[%s964_s1] sm:$0xff]  ;;  %vm292_vm2 = vcmask 1046528   ;;  %vm306_vm3 = vcmask 1045504  }
   0xd   : > { %s273_s29 = scalar_lea.vmem %s963_s0, %s753_s26  ;;  %771 = vmatpush3.msk.msra.mxu0 %vm351_vm1, %v329_v3  ;;  %vm324_vm4 = vcmask 64512   ;;  %vm340_vm5 = vcmask 1040384   ;;  %vm346_vm6 = vcmask 97280   ;;  %vm432_vm7 = vcmask 130048   ;;  %v740_v34 = vld [vmem:[%s965_s2] ss:$0 sm:$0xff]  ;;  %s278_s17 = scalar_lea.vmem %s970_s7, %s753_s26 }
   0xe   : > { %v883_v1 = vld [vmem:[%s273_s29 + $0x8] sm:$0xff]  ;;  %v279_v2 = vld [vmem:[%s273_s29] sm:$0xff]  ;;  %772 = vmatprep.subr.mxu0 %v328_v4  ;;  %433 = vst.msk [vmem:[#allocation3] sm:$0xff] %vm432_vm7, %v818_v0  ;;  %434 = vst.msk [vmem:[#allocation3 + $0x18] sm:$0xff] %vm432_vm7, %v818_v0  ;;  %vm473_vm8 = vcmask 261120   ;;  %vm498_vm9 = vcmask 392192  }
   0xf   : > { %285 = vst.msk [vmem:[#allocation2 + $0x10] sm:$0xff] %vm281_vm0, %v883_v1  ;;  %284 = vst.msk [vmem:[#allocation2 + $0x8] sm:$0xff] %vm281_vm0, %v279_v2  ;;  %773 = vmatpush3.msra.mxu0 %v328_v4  ;;  %v482_v40 = vld [vmem:[%s966_s3 + $0x28] sm:$0xff]  ;;  %v481_v42 = vld [vmem:[%s966_s3 + $0x20] sm:$0xff] }
  0x10   : > { %777 = vmatprep.subr.mxu1 %v482_v40  ;;  %v480_v43 = vld [vmem:[%s966_s3 + $0x18] sm:$0xff]  ;;  %v479_v44 = vld [vmem:[%s966_s3 + $0x10] sm:$0xff]  ;;  %v578_v45 = vld [vmem:[%s968_s5] sm:$0xf] }
  0x11   : > { %778 = vmatpush3.msra.mxu1 %v482_v40  ;;  %v478_v46 = vld [vmem:[%s966_s3 + $0x8] sm:$0xff]  ;;  %792 = vmatprep.subr.msk.mxu0 %vm351_vm1, %v578_v45  ;;  %v477_v49 = vld [vmem:[%s966_s3] sm:$0xff] }
  0x12   : > { %779 = vmatprep.subr.mxu1 %v481_v42 }
  0x13   : > { %v289_v9 = vld [vmem:[#allocation2 + $0x18] sm:$0xff]  ;;  %v286_v18 = vld [vmem:[#allocation2] sm:$0xff]  ;;  %780 = vmatpush3.msra.mxu1 %v481_v42 }
  0x14   : > { %v310_v13 = vrot.slane %v289_v9, 2  ;;  %781 = vmatprep.subr.mxu1 %v480_v43 }
  0x15   : > { %782 = vmatpush3.msra.mxu1 %v480_v43  ;;  %v440_v53 = vld [vmem:[#allocation3 + $0x18] sm:$0xff]  ;;  %v437_v61 = vld [vmem:[#allocation3] sm:$0xff] }
  0x16   : > { %v288_v5 = vld [vmem:[#allocation2 + $0x10] sm:$0xff]  ;;  %v287_v6 = vld [vmem:[#allocation2 + $0x8] sm:$0xff]  ;;  %783 = vmatprep.subr.mxu1 %v479_v44  ;;  %v459_v56 = vrot.slane %v440_v53, 2 }
  0x17   : > { %v294_v7 = vrot.slane %v288_v5, 1  ;;  %v293_v8 = vrot.slane %v287_v6, 1  ;;  %v307_v10 = vrot.slane %v287_v6, 2  ;;  %v308_v11 = vrot.slane %v288_v5, 2  ;;  %784 = vmatpush3.msra.mxu1 %v479_v44 }
  0x18   : > { %785 = vmatprep.subr.mxu1 %v478_v46 }
  0x19   : > { %300 = vrot.lane.b32.xlu1 %v294_v7, %s819_s11  ;;  %296 = vrot.lane.b32.xlu0 %v293_v8, %s819_s11  ;;  %v295_v12 = vsel %vm292_vm2, %v293_v8, %v294_v7  ;;  %v311_v14 = vsel %vm306_vm3, %v308_v11, %v310_v13  ;;  %v309_v15 = vsel %vm306_vm3, %v307_v10, %v308_v11 }
  0x1a   : > { %786 = vmatpush3.msra.mxu1 %v478_v46 }
  0x1b   : > { %787 = vmatprep.subr.mxu1 %v477_v49 }
  0x1c   : > { %788 = vmatpush3.msra.mxu1 %v477_v49 }
  0x1d   : > { %312 = vrot.lane.b32.xlu1 %v307_v10, %s820_s12  ;;  %298 = vrot.lane.b32.xlu0 %v295_v12, %s819_s11 }
  0x21   : > { %316 = vrot.lane.b32.xlu1 %v311_v14, %s820_s12  ;;  %314 = vrot.lane.b32.xlu0 %v309_v15, %s820_s12  ;;  %v747_v14 = vld [vmem:[%s969_s6] ss:$0 sm:$0xff] }
  0x22   : > { %v744_v15 = vld [vmem:[%s967_s4] ss:$0 sm:$0xff] }
  0x8b   : > { %v301_v16 = vpop.permute.xlu1 %300  ;;  %v297_v17 = vpop.permute.xlu0 %296 }
  0x8c   : > { %v321_v21 = vsel %vm281_vm0, %v286_v18, %v297_v17  ;;  %v323_v23 = vsel %vm281_vm0, %v288_v5, %v301_v16 }
  0x8f   : > { %v313_v19 = vpop.permute.xlu1 %312  ;;  %v299_v20 = vpop.permute.xlu0 %298 }
  0x90   : > { %v325_v22 = vsel %vm324_vm4, %v321_v21, %v313_v19  ;;  %v322_v24 = vsel %vm281_vm0, %v287_v6, %v299_v20 }
  0x91   : > { %v341_v29 = vrot.slane %v325_v22, 7 }
  0x93   : > { %v317_v25 = vpop.permute.xlu1 %316  ;;  %v315_v26 = vpop.permute.xlu0 %314 }
  0x94   : > { %v327_v27 = vsel %vm324_vm4, %v323_v23, %v317_v25  ;;  %v326_v28 = vsel %vm324_vm4, %v322_v24, %v315_v26 }
  0x95   : > { %v344_v30 = vrot.slane %v327_v27, 7  ;;  %v342_v31 = vrot.slane %v326_v28, 7 }
  0x97   : > { %v343_v32 = vsel %vm340_vm5, %v341_v29, %v342_v31  ;;  %v345_v33 = vsel %vm340_vm5, %v342_v31, %v344_v30 }
  0x98   : > { %774 = vmatprep.mubr.msk.f32.mxu0 %vm346_vm6, %v343_v32 }
  0x99   : > { %775 = vmatmul.mubr.msk.f32.vlgmr.msra.gmra.mxu0 %vm346_vm6, %v345_v33 }
  0x9a   : > { %794 = vmatprep.mubr.msk.f32.mxu0 %vm281_vm0, %v279_v2  ;;  %793 = vmatpush3.msk.msra.mxu0 %vm351_vm1, %v578_v45 }
  0x9d   : > { %795 = vmatmul.mubr.msk.f32.vlgmr.msra.gmra.mxu0 %vm281_vm0, %v883_v1 }
 0x159   : > { %v776_v35 = vpop.f32.mrf.mxu0 }
 0x15a   : > { %v427_v36 = vadd.f32 %v776_v35, %v740_v34 }
 0x15b   : > { %v421_v37 = vpop.f32.mrf.mxu0 }
 0x15c   : > { %v431_v38 = vmax.f32 %v427_v36, 0.0  ;;  %v422_v39 = vadd.f32 %v740_v34, %v421_v37 }
 0x15d   : > { %v796_v13 = vpop.f32.mrf.mxu0 }
 0x15e   : > { %436 = vst.msk [vmem:[#allocation3 + $0x10] sm:$0xff] %vm432_vm7, %v431_v38  ;;  %v430_v41 = vmax.f32 %v422_v39, 0.0  ;;  %v667_v16 = vadd.f32 %v796_v13, %v747_v14 }
 0x15f   : > { %v661_v18 = vpop.f32.mrf.mxu0 }
 0x160   : > { %435 = vst.msk [vmem:[#allocation3 + $0x8] sm:$0xff] %vm432_vm7, %v430_v41  ;;  %v662_v22 = vadd.f32 %v747_v14, %v661_v18 }
 0x165   : > { %v439_v47 = vld [vmem:[#allocation3 + $0x10] sm:$0xff] }
 0x166   : > { %v444_v48 = vrot.slane %v439_v47, 1  ;;  %v457_v55 = vrot.slane %v439_v47, 2 }
 0x167   : > { %v438_v50 = vld [vmem:[#allocation3 + $0x8] sm:$0xff] }
 0x168   : > { %450 = vrot.lane.b32.xlu0 %v444_v48, %s821_s9  ;;  %v456_v51 = vrot.slane %v438_v50, 2  ;;  %v443_v52 = vrot.slane %v438_v50, 1  ;;  %v460_v58 = vsel %vm306_vm3, %v457_v55, %v459_v56 }
 0x16a   : > { %461 = vrot.lane.b32.xlu1 %v456_v51, %s822_s10  ;;  %v445_v54 = vsel %vm292_vm2, %v443_v52, %v444_v48  ;;  %v458_v57 = vsel %vm306_vm3, %v456_v51, %v457_v55 }
 0x16c   : > { %446 = vrot.lane.b32.xlu0 %v443_v52, %s821_s9 }
 0x16e   : > { %448 = vrot.lane.b32.xlu1 %v445_v54, %s821_s9 }
 0x170   : > { %463 = vrot.lane.b32.xlu0 %v458_v57, %s822_s10 }
 0x172   : > { %465 = vrot.lane.b32.xlu1 %v460_v58, %s822_s10 }
 0x1da   : > { %v451_v59 = vpop.permute.xlu0 %450 }
 0x1db   : > { %v472_v5 = vsel %vm432_vm7, %v439_v47, %v451_v59 }
 0x1dc   : > { %v462_v60 = vpop.permute.xlu1 %461 }
 0x1de   : > { %v447_v62 = vpop.permute.xlu0 %446 }
 0x1df   : > { %v470_v63 = vsel %vm432_vm7, %v437_v61, %v447_v62 }
 0x1e0   : > { %v449_v0 = vpop.permute.xlu1 %448  ;;  %v474_v1 = vsel %vm473_vm8, %v470_v63, %v462_v60 }
 0x1e1   : > { %v471_v2 = vsel %vm432_vm7, %v438_v50, %v449_v0  ;;  %v493_v6 = vrot.slane %v474_v1, 7 }
 0x1e2   : > { %v464_v3 = vpop.permute.xlu0 %463 }
 0x1e3   : > { %v475_v4 = vsel %vm473_vm8, %v471_v2, %v464_v3 }
 0x1e4   : > { %v494_v7 = vrot.slane %v475_v4, 7  ;;  %v466_v8 = vpop.permute.xlu1 %465 }
 0x1e5   : > { %v476_v9 = vsel %vm473_vm8, %v472_v5, %v466_v8 }
 0x1e6   : > { %v496_v10 = vrot.slane %v476_v9, 7  ;;  %v495_v11 = vsel %vm340_vm5, %v493_v6, %v494_v7 }
 0x1e7   : > { %789 = vmatprep.mubr.msk.f32.mxu1 %vm498_vm9, %v495_v11 }
 0x1e8   : > { %v497_v12 = vsel %vm340_vm5, %v494_v7, %v496_v10 }
 0x1e9   : > { %790 = vmatmul.mubr.msk.f32.vlgmr.msra.gmra.mxu1 %vm498_vm9, %v497_v12 }
 0x2a9   : > { %v791_v17 = vpop.f32.mrf.mxu1 }
 0x2aa   : > { %v575_v19 = vadd.f32 %v791_v17, %v744_v15 }
 0x2ab   : > { %v569_v20 = vpop.f32.mrf.mxu1 }
 0x2ac   : > { %v671_v21 = vadd.f32 %v667_v16, %v575_v19  ;;  %v570_v23 = vadd.f32 %v744_v15, %v569_v20 }
 0x2ae   : > { %v673_v24 = vmax.f32 %v671_v21, 0.0  ;;  %v670_v25 = vadd.f32 %v662_v22, %v570_v23 }
 0x2b0   : > { %675 = vst.msk [vmem:[%s278_s17 + $0x8] sm:$0xff] %vm432_vm7, %v673_v24  ;;  %v672_v26 = vmax.f32 %v670_v25, 0.0 }
 0x2b2   : > { %674 = vst.msk [vmem:[%s278_s17] sm:$0xff] %vm432_vm7, %v672_v26 }
 0x2b3 PF: > { %s17_s24 = sadd.s32 1, %s816_s24  }
 0x2b4   : > { %p14_p4 = scmp.ge.s32.totalorder %s17_s24, 4  }
 0x2b6   :  { %16 = sbr.rel (!%p14_p4) target bundleno = 1 (0x1), region = 78 }

</bundles_post_ra>
